<compile_context>
chip_gen: v7x
topology: tpu7x:2x2x1
jax: 0.10.0
libtpu: 0.0.40
codegen_flags: <defaults>
</compile_context>

<pallas_src>
import functools

import jax
import jax.numpy as jnp
from jax.experimental import pallas as pl
from jax.experimental.pallas import tpu as pltpu

IN_F = 28 * 28   # 784
H1 = 128
H2 = 64
OUT_F = 10


def _round_up(x, m):
    return ((x + m - 1) // m) * m


def _cdiv(a, b):
    return (a + b - 1) // b


def _mlp_kernel(x_ref, w1_ref, b1_ref, w2_ref, b2_ref, w3_ref, b3_ref, o_ref):
    # x_ref: [tb, 784] bf16
    # w1: [784,128] bf16, w2: [128,64] bf16, w3: [64,10] bf16
    # biases f32: b1 [1,128], b2 [1,64], b3 [1,10]
    h1 = jnp.dot(x_ref[...], w1_ref[...], preferred_element_type=jnp.float32) + b1_ref[...]
    h1 = jnp.maximum(h1, 0.0).astype(jnp.bfloat16)
    h2 = jnp.dot(h1, w2_ref[...], preferred_element_type=jnp.float32) + b2_ref[...]
    h2 = jnp.maximum(h2, 0.0).astype(jnp.bfloat16)
    h3 = jnp.dot(h2, w3_ref[...], preferred_element_type=jnp.float32) + b3_ref[...]
    o_ref[...] = h3.astype(o_ref.dtype)


def init_params(key):
    """PyTorch nn.Linear-style init (uniform +-1/sqrt(fan_in)). Weights stored [in, out]."""
    def linear(key, fan_in, fan_out):
        kw, kb = jax.random.split(key)
        bound = 1.0 / jnp.sqrt(fan_in)
        w = jax.random.uniform(kw, (fan_in, fan_out), jnp.float32, -bound, bound)
        b = jax.random.uniform(kb, (1, fan_out), jnp.float32, -bound, bound)
        return w, b

    k1, k2, k3 = jax.random.split(key, 3)
    w1, b1 = linear(k1, IN_F, H1)
    w2, b2 = linear(k2, H1, H2)
    w3, b3 = linear(k3, H2, OUT_F)
    return (w1, b1, w2, b2, w3, b3)


def prepare_params(params):
    """One-time conversion to kernel layout: bf16 weights, f32 biases. No K/N padding needed."""
    w1, b1, w2, b2, w3, b3 = params
    return (
        w1.astype(jnp.bfloat16),   # [784, 128]
        b1.astype(jnp.float32),    # [1, 128]
        w2.astype(jnp.bfloat16),   # [128, 64]
        b2.astype(jnp.float32),    # [1, 64]
        w3.astype(jnp.bfloat16),   # [64, 10]
        b3.astype(jnp.float32),    # [1, 10]
    )


def _choose_tile_b(batch, tile_b):
    """Balanced tiles, multiples of 16 (bf16 sublane packing); >=2 grid steps for batch>=32
    so both v7x TensorCores get a share of the work."""
    if batch <= 16:
        return 16
    n_tiles = _cdiv(batch, tile_b)
    if n_tiles < 2 and batch >= 32:
        n_tiles = 2
    return _round_up(_cdiv(batch, n_tiles), 16)


def simple_net_forward(x, kparams, tile_b=1024):
    """x: anything that flattens to [-1, 784] (e.g. [B,1,28,28]). Returns [B, 10] f32."""
    w1, b1, w2, b2, w3, b3 = kparams
    # Cast to bf16 up front so the padded copy (if any) and the kernel DMA are half-size.
    x2d = x.reshape(-1, IN_F).astype(jnp.bfloat16)
    batch = x2d.shape[0]

    tb = _choose_tile_b(batch, tile_b)
    b_pad = tb * _cdiv(batch, tb)
    if b_pad != batch:
        x2d = jnp.pad(x2d, ((0, b_pad - batch), (0, 0)))
    grid = (b_pad // tb,)

    pinned = lambda shp: pl.BlockSpec(shp, lambda i: (0, 0))  # weights stay VMEM-resident

    weight_bytes = (w1.size + w2.size + w3.size) * 2 + (b1.size + b2.size + b3.size) * 4
    cost = pl.CostEstimate(
        flops=2 * b_pad * (IN_F * H1 + H1 * H2 + H2 * OUT_F),
        bytes_accessed=b_pad * IN_F * 2 + weight_bytes + b_pad * OUT_F * 4,
        transcendentals=0,
    )

    out = pl.pallas_call(
        _mlp_kernel,
        out_shape=jax.ShapeDtypeStruct((b_pad, OUT_F), jnp.float32),
        grid=grid,
        in_specs=[
            pl.BlockSpec((tb, IN_F), lambda i: (i, 0)),  # x: tiled over batch, full 784 width
            pinned((IN_F, H1)),
            pinned((1, H1)),
            pinned((H1, H2)),
            pinned((1, H2)),
            pinned((H2, OUT_F)),
            pinned((1, OUT_F)),
        ],
        out_specs=pl.BlockSpec((tb, OUT_F), lambda i: (i, 0)),
        compiler_params=pltpu.CompilerParams(dimension_semantics=("parallel",)),
        cost_estimate=cost,
    )(x2d, w1, b1, w2, b2, w3, b3)

    return out if b_pad == batch else out[:batch]


def _reference(x, params):
    w1, b1, w2, b2, w3, b3 = params
    x2d = x.reshape(-1, IN_F).astype(jnp.float32)
    h1 = jnp.maximum(x2d @ w1 + b1, 0.0)
    h2 = jnp.maximum(h1 @ w2 + b2, 0.0)
    return h2 @ w3 + b3


if __name__ == "__main__":
    key = jax.random.PRNGKey(0)
    kp, kx = jax.random.split(key)
    params = init_params(kp)
    kparams = prepare_params(params)

    # MNIST-like input: batch=8, NCHW [8, 1, 28, 28]
    x = jax.random.normal(kx, (8, 1, 28, 28), jnp.float32)

    fwd = jax.jit(functools.partial(simple_net_forward, tile_b=1024))
    out = fwd(x, kparams)
    out = jax.block_until_ready(out)

    ref = _reference(x, params)  # full-f32 reference
    assert out.shape == (8, 10), out.shape
    # Inputs/weights/activations are bf16 on the MXU (f32 accumulation) -> looser tolerance.
    assert jnp.allclose(out, ref, atol=2e-2, rtol=2e-2), (
        "mismatch vs reference; max abs diff = %f" % float(jnp.max(jnp.abs(out - ref))))
    print("KERNEL_OK")
</pallas_src>

<mosaic_0001>
module attributes {stable_mosaic.version = 11 : i64} {
  func.func @_mlp_kernel(%arg0: i32, %arg1: memref<16x784xbf16, #tpu.memory_space<vmem>>, %arg2: memref<784x128xbf16, #tpu.memory_space<vmem>>, %arg3: memref<1x128xf32, #tpu.memory_space<vmem>>, %arg4: memref<128x64xbf16, #tpu.memory_space<vmem>>, %arg5: memref<1x64xf32, #tpu.memory_space<vmem>>, %arg6: memref<64x10xbf16, #tpu.memory_space<vmem>>, %arg7: memref<1x10xf32, #tpu.memory_space<vmem>>, %arg8: memref<16x10xf32, #tpu.memory_space<vmem>>) attributes {dimension_semantics = [#tpu.dimension_semantics<parallel>], iteration_bounds = array<i64: 1>, scalar_prefetch = 0 : i64, scratch_operands = 0 : i64, tpu.core_type = #tpu.core_type<tc>, window_params = [{transform_indices = @transform_0, window_bounds = array<i64: 16, 784>}, {pipeline_mode = #tpu.pipeline_mode<synchronous>, transform_indices = @transform_1, window_bounds = array<i64: 784, 128>}, {pipeline_mode = #tpu.pipeline_mode<synchronous>, transform_indices = @transform_2, window_bounds = array<i64: 1, 128>}, {pipeline_mode = #tpu.pipeline_mode<synchronous>, transform_indices = @transform_3, window_bounds = array<i64: 128, 64>}, {pipeline_mode = #tpu.pipeline_mode<synchronous>, transform_indices = @transform_4, window_bounds = array<i64: 1, 64>}, {pipeline_mode = #tpu.pipeline_mode<synchronous>, transform_indices = @transform_5, window_bounds = array<i64: 64, 10>}, {pipeline_mode = #tpu.pipeline_mode<synchronous>, transform_indices = @transform_6, window_bounds = array<i64: 1, 10>}, {transform_indices = @transform_7, window_bounds = array<i64: 16, 10>}]} {
    %c0 = arith.constant 0 : index
    %c0_0 = arith.constant 0 : index
    %0 = vector.load %arg1[%c0, %c0_0] : memref<16x784xbf16, #tpu.memory_space<vmem>>, vector<16x784xbf16>
    %c0_1 = arith.constant 0 : index
    %c0_2 = arith.constant 0 : index
    %1 = vector.load %arg2[%c0_1, %c0_2] : memref<784x128xbf16, #tpu.memory_space<vmem>>, vector<784x128xbf16>
    %cst = arith.constant dense<0.000000e+00> : vector<16x128xf32>
    %2 = tpu.matmul %0, %1, %cst {dimension_numbers = #tpu.dot_dimension_numbers<[1], [0], [0], [1], [0, 0, 1, 1], [], []>} : vector<16x784xbf16>, vector<784x128xbf16>, vector<16x128xf32> -> vector<16x128xf32>
    %c0_3 = arith.constant 0 : index
    %c0_4 = arith.constant 0 : index
    %3 = vector.load %arg3[%c0_3, %c0_4] : memref<1x128xf32, #tpu.memory_space<vmem>>, vector<1x128xf32>
    %4 = vector.broadcast %3 : vector<1x128xf32> to vector<16x128xf32>
    %5 = arith.addf %2, %4 : vector<16x128xf32>
    %cst_5 = arith.constant 0.000000e+00 : f32
    %6 = vector.broadcast %cst_5 : f32 to vector<16x128xf32>
    %7 = arith.maximumf %5, %6 : vector<16x128xf32>
    %8 = arith.truncf %7 : vector<16x128xf32> to vector<16x128xbf16>
    %c0_6 = arith.constant 0 : index
    %c0_7 = arith.constant 0 : index
    %9 = vector.load %arg4[%c0_6, %c0_7] : memref<128x64xbf16, #tpu.memory_space<vmem>>, vector<128x64xbf16>
    %cst_8 = arith.constant dense<0.000000e+00> : vector<16x64xf32>
    %10 = tpu.matmul %8, %9, %cst_8 {dimension_numbers = #tpu.dot_dimension_numbers<[1], [0], [0], [1], [0, 0, 1, 1], [], []>} : vector<16x128xbf16>, vector<128x64xbf16>, vector<16x64xf32> -> vector<16x64xf32>
    %c0_9 = arith.constant 0 : index
    %c0_10 = arith.constant 0 : index
    %11 = vector.load %arg5[%c0_9, %c0_10] : memref<1x64xf32, #tpu.memory_space<vmem>>, vector<1x64xf32>
    %12 = vector.broadcast %11 : vector<1x64xf32> to vector<16x64xf32>
    %13 = arith.addf %10, %12 : vector<16x64xf32>
    %cst_11 = arith.constant 0.000000e+00 : f32
    %14 = vector.broadcast %cst_11 : f32 to vector<16x64xf32>
    %15 = arith.maximumf %13, %14 : vector<16x64xf32>
    %16 = arith.truncf %15 : vector<16x64xf32> to vector<16x64xbf16>
    %c0_12 = arith.constant 0 : index
    %c0_13 = arith.constant 0 : index
    %17 = vector.load %arg6[%c0_12, %c0_13] : memref<64x10xbf16, #tpu.memory_space<vmem>>, vector<64x10xbf16>
    %cst_14 = arith.constant dense<0.000000e+00> : vector<16x10xf32>
    %18 = tpu.matmul %16, %17, %cst_14 {dimension_numbers = #tpu.dot_dimension_numbers<[1], [0], [0], [1], [0, 0, 1, 1], [], []>} : vector<16x64xbf16>, vector<64x10xbf16>, vector<16x10xf32> -> vector<16x10xf32>
    %c0_15 = arith.constant 0 : index
    %c0_16 = arith.constant 0 : index
    %19 = vector.load %arg7[%c0_15, %c0_16] : memref<1x10xf32, #tpu.memory_space<vmem>>, vector<1x10xf32>
    %20 = vector.broadcast %19 : vector<1x10xf32> to vector<16x10xf32>
    %21 = arith.addf %18, %20 : vector<16x10xf32>
    %c0_17 = arith.constant 0 : index
    %c0_18 = arith.constant 0 : index
    %22 = vector.load %arg8[%c0_17, %c0_18] : memref<16x10xf32, #tpu.memory_space<vmem>>, vector<16x10xf32>
    tpu.vector_store %arg8[%c0_17, %c0_18], %21 {strides = array<i32>} : memref<16x10xf32, #tpu.memory_space<vmem>>, vector<16x10xf32>,
    return
  }
  func.func @transform_0(%arg0: i32) -> (i32, i32) {
    %c0_i32 = arith.constant 0 : i32
    %c0_i32_0 = arith.constant 0 : i32
    return %arg0, %c0_i32 : i32, i32
  }
  func.func @transform_1(%arg0: i32) -> (i32, i32) {
    %c0_i32 = arith.constant 0 : i32
    %c0_i32_0 = arith.constant 0 : i32
    %c0_i32_1 = arith.constant 0 : i32
    return %c0_i32, %c0_i32_0 : i32, i32
  }
  func.func @transform_2(%arg0: i32) -> (i32, i32) {
    %c0_i32 = arith.constant 0 : i32
    %c0_i32_0 = arith.constant 0 : i32
    %c0_i32_1 = arith.constant 0 : i32
    return %c0_i32, %c0_i32_0 : i32, i32
  }
  func.func @transform_3(%arg0: i32) -> (i32, i32) {
    %c0_i32 = arith.constant 0 : i32
    %c0_i32_0 = arith.constant 0 : i32
    %c0_i32_1 = arith.constant 0 : i32
    return %c0_i32, %c0_i32_0 : i32, i32
  }
  func.func @transform_4(%arg0: i32) -> (i32, i32) {
    %c0_i32 = arith.constant 0 : i32
    %c0_i32_0 = arith.constant 0 : i32
    %c0_i32_1 = arith.constant 0 : i32
    return %c0_i32, %c0_i32_0 : i32, i32
  }
  func.func @transform_5(%arg0: i32) -> (i32, i32) {
    %c0_i32 = arith.constant 0 : i32
    %c0_i32_0 = arith.constant 0 : i32
    %c0_i32_1 = arith.constant 0 : i32
    return %c0_i32, %c0_i32_0 : i32, i32
  }
  func.func @transform_6(%arg0: i32) -> (i32, i32) {
    %c0_i32 = arith.constant 0 : i32
    %c0_i32_0 = arith.constant 0 : i32
    %c0_i32_1 = arith.constant 0 : i32
    return %c0_i32, %c0_i32_0 : i32, i32
  }
  func.func @transform_7(%arg0: i32) -> (i32, i32) {
    %c0_i32 = arith.constant 0 : i32
    %c0_i32_0 = arith.constant 0 : i32
    return %arg0, %c0_i32 : i32, i32
  }
}

</mosaic_0001>

<bundles_post_ra>
// kernel: simple_net_forward.1
= control target key start
LH: loop header
LB: loop body
LE: loop exit
PB: predicated region body
PF: predicated region fallthrough
CT: control target
= control target key end

     0   :  { %v1112_v38 = vmov 0.0   ;;  %vm1113_vm0 = vmmov 0   ;;  %vm469_vm1 = vcmask 130048   ;;  %vm794_vm2 = vcmask 523264   ;;  %s1392_s1 = inlined_call_operand.vmem [shape: bf16[784,128], index: 1, kind: input, shape index: {}]   ;;  %s1393_s0 = inlined_call_operand.vmem [shape: bf16[16,784], index: 0, kind: input, shape index: {}]   ;;  %s1394_s3 = inlined_call_operand.vmem [shape: bf16[128,64], index: 3, kind: input, shape index: {}]   ;;  %s1395_s5 = inlined_call_operand.vmem [shape: bf16[64,10], index: 5, kind: input, shape index: {}]   ;;  %s1396_s2 = inlined_call_operand.vmem [shape: f32[1,128], index: 2, kind: input, shape index: {}]   ;;  %s1397_s4 = inlined_call_operand.vmem [shape: f32[1,64], index: 4, kind: input, shape index: {}]   ;;  %s1398_s6 = inlined_call_operand.vmem [shape: f32[1,10], index: 6, kind: input, shape index: {}]   ;;  %s1399_s7 = inlined_call_operand.vmem [shape: f32[16,10], index: 7, kind: output, shape index: {}]  }
   0x1   :  { %v1041_v0 = vld [vmem:[%s1392_s1 + $0x40] sm:$0xff]   ;;  %v1045_v4 = vld [vmem:[%s1392_s1 + $0x48] sm:$0xff]   ;;  %v1049_v8 = vld [vmem:[%s1392_s1 + $0x50] sm:$0xff]   ;;  %vm839_vm3 = vcmask 80896  }
   0x2   :  { %v1042_v1 = vld [vmem:[%s1392_s1] sm:$0xff]   ;;  %919 = vmatprep.subr.bf16.mxu0 %v1041_v0  ;;  %v1046_v5 = vld [vmem:[%s1392_s1 + $0x8] sm:$0xff]   ;;  %v1050_v9 = vld [vmem:[%s1392_s1 + $0x10] sm:$0xff]  }
   0x3   :  { %v1043_v2 = vld [vmem:[%s1392_s1 + $0xc0] sm:$0xff]   ;;  %920 = vmatpush3.bf16.msra.mxu0 %v1042_v1  ;;  %v1047_v6 = vld [vmem:[%s1392_s1 + $0xc8] sm:$0xff]   ;;  %v1051_v10 = vld [vmem:[%s1392_s1 + $0xd0] sm:$0xff]  }
   0x4   :  { %v1044_v3 = vld [vmem:[%s1392_s1 + $0x80] sm:$0xff]   ;;  %941 = vmatprep.subr.bf16.mxu1 %v1043_v2  ;;  %921 = vmatprep.subr.bf16.mxu0 %v1045_v4  ;;  %v1048_v7 = vld [vmem:[%s1392_s1 + $0x88] sm:$0xff]   ;;  %v1052_v11 = vld [vmem:[%s1392_s1 + $0x90] sm:$0xff]  }
   0x5   :  { %942 = vmatpush3.bf16.msra.mxu1 %v1044_v3  ;;  %v1053_v12 = vld [vmem:[%s1392_s1 + $0x58] sm:$0xff]   ;;  %v1057_v16 = vld [vmem:[%s1392_s1 + $0x60] sm:$0xff]   ;;  %v1061_v20 = vld [vmem:[%s1392_s1 + $0x68] sm:$0xff]  }
   0x6   :  { %943 = vmatprep.subr.bf16.mxu1 %v1047_v6  ;;  %v1054_v13 = vld [vmem:[%s1392_s1 + $0x18] sm:$0xff]   ;;  %v1058_v17 = vld [vmem:[%s1392_s1 + $0x20] sm:$0xff]   ;;  %v1062_v21 = vld [vmem:[%s1392_s1 + $0x28] sm:$0xff]  }
   0x7   :  { %922 = vmatpush3.bf16.msra.mxu0 %v1046_v5  ;;  %v1055_v14 = vld [vmem:[%s1392_s1 + $0xd8] sm:$0xff]   ;;  %v1059_v18 = vld [vmem:[%s1392_s1 + $0xe0] sm:$0xff]   ;;  %v1063_v22 = vld [vmem:[%s1392_s1 + $0xe8] sm:$0xff]  }
   0x8   :  { %923 = vmatprep.subr.bf16.mxu0 %v1049_v8  ;;  %v1056_v15 = vld [vmem:[%s1392_s1 + $0x98] sm:$0xff]   ;;  %v1060_v19 = vld [vmem:[%s1392_s1 + $0xa0] sm:$0xff]   ;;  %v1064_v23 = vld [vmem:[%s1392_s1 + $0xa8] sm:$0xff]  }
   0x9   :  { %944 = vmatpush3.bf16.msra.mxu1 %v1048_v7  ;;  %v1065_v24 = vld [vmem:[%s1392_s1 + $0x70] sm:$0xff]   ;;  %v1069_v28 = vld [vmem:[%s1392_s1 + $0x78] sm:$0xff]   ;;  %v1074_v32 = vld [vmem:[%s1393_s0 + $0x4] ss:$28 sps:$4 sm:$0xff]  }
   0xa   :  { %945 = vmatprep.subr.bf16.mxu1 %v1051_v10  ;;  %v1066_v25 = vld [vmem:[%s1392_s1 + $0x30] sm:$0xff]   ;;  %v1070_v29 = vld [vmem:[%s1392_s1 + $0x38] sm:$0xff]   ;;  %505 = vmatprep.mubr.bf16.mxu0 %v1074_v32  ;;  %v1076_v34 = vld [vmem:[%s1392_s1 + $0x140] sm:$0xff]  }
   0xb   :  { %924 = vmatpush3.bf16.msra.mxu0 %v1050_v9  ;;  %v1067_v26 = vld [vmem:[%s1392_s1 + $0xf0] sm:$0xff]   ;;  %v1071_v30 = vld [vmem:[%s1392_s1 + $0xf8] sm:$0xff]   ;;  %v1077_v35 = vld [vmem:[%s1393_s0 + $0x8] ss:$28 sps:$4 sm:$0xff]  }
   0xc   :  { %925 = vmatprep.subr.bf16.mxu0 %v1053_v12  ;;  %v1068_v27 = vld [vmem:[%s1392_s1 + $0xb0] sm:$0xff]   ;;  %v1072_v31 = vld [vmem:[%s1393_s0] ss:$28 sps:$4 sm:$0xff]   ;;  %v1079_v36 = vld [vmem:[%s1393_s0 + $0xc] ss:$28 sps:$4 sm:$0xff]  }
   0xd   :  { %946 = vmatpush3.bf16.msra.mxu1 %v1052_v11  ;;  %v1075_v33 = vld [vmem:[%s1392_s1 + $0xb8] sm:$0xff]   ;;  %v1080_v37 = vld [vmem:[%s1392_s1 + $0x100] sm:$0xff]   ;;  %546 = vmatprep.mubr.bf16.mxu1 %v1079_v36  ;;  %v1081_v39 = vld [vmem:[%s1392_s1 + $0x148] sm:$0xff]  }
   0xe   :  { %947 = vmatprep.subr.bf16.mxu1 %v1055_v14  ;;  %v1082_v40 = vld [vmem:[%s1392_s1 + $0x108] sm:$0xff]   ;;  %v1083_v41 = vld [vmem:[%s1392_s1 + $0x150] sm:$0xff]   ;;  %v1085_v43 = vld [vmem:[%s1392_s1 + $0x158] sm:$0xff]  }
   0xf   :  { %926 = vmatpush3.bf16.msra.mxu0 %v1054_v13  ;;  %v1084_v42 = vld [vmem:[%s1392_s1 + $0x110] sm:$0xff]   ;;  %v1086_v44 = vld [vmem:[%s1392_s1 + $0x118] sm:$0xff]   ;;  %v1087_v45 = vld [vmem:[%s1392_s1 + $0x160] sm:$0xff]  }
  0x10   :  { %927 = vmatprep.subr.bf16.mxu0 %v1057_v16  ;;  %v1088_v46 = vld [vmem:[%s1392_s1 + $0x120] sm:$0xff]   ;;  %v1089_v47 = vld [vmem:[%s1392_s1 + $0x168] sm:$0xff]   ;;  %v1098_v49 = vld [vmem:[%s1393_s0 + $0x14] ss:$28 sps:$4 sm:$0xff]  }
  0x11   :  { %948 = vmatpush3.bf16.msra.mxu1 %v1056_v15  ;;  %v1095_v48 = vld [vmem:[%s1392_s1 + $0x180] sm:$0xff]   ;;  %v1099_v50 = vld [vmem:[%s1393_s0 + $0x18] ss:$28 sps:$4 sm:$0xff]   ;;  %v1090_v51 = vld [vmem:[%s1392_s1 + $0x128] sm:$0xff]  }
  0x12   :  { %949 = vmatprep.subr.bf16.mxu1 %v1059_v18  ;;  %v1091_v52 = vld [vmem:[%s1392_s1 + $0x170] sm:$0xff]   ;;  %v1093_v54 = vld [vmem:[%s1392_s1 + $0x178] sm:$0xff]   ;;  %v1100_v57 = vld [vmem:[%s1394_s3] sm:$0xff]  }
  0x13   :  { %928 = vmatpush3.bf16.msra.mxu0 %v1058_v17  ;;  %v1092_v53 = vld [vmem:[%s1392_s1 + $0x130] sm:$0xff]   ;;  %v1094_v55 = vld [vmem:[%s1392_s1 + $0x138] sm:$0xff]   ;;  %v1101_v58 = vld [vmem:[%s1394_s3 + $0x8] sm:$0xff]  }
  0x14   :  { %929 = vmatprep.subr.bf16.mxu0 %v1061_v20  ;;  %v1096_v56 = vld [vmem:[%s1393_s0 + $0x10] ss:$28 sps:$4 sm:$0xff]   ;;  %v1103_v60 = vld [vmem:[%s1394_s3 + $0x18] sm:$0xff]   ;;  %v1104_v61 = vld [vmem:[%s1394_s3 + $0x20] sm:$0xff]  }
  0x15   :  { %950 = vmatpush3.bf16.msra.mxu1 %v1060_v19  ;;  %v1102_v59 = vld [vmem:[%s1394_s3 + $0x10] sm:$0xff]   ;;  %v1105_v62 = vld [vmem:[%s1394_s3 + $0x28] sm:$0xff]   ;;  %v1107_v0 = vld [vmem:[%s1394_s3 + $0x38] sm:$0xff]  }
  0x16   :  { %951 = vmatprep.subr.bf16.mxu1 %v1063_v22  ;;  %v1106_v63 = vld [vmem:[%s1394_s3 + $0x30] sm:$0xff]   ;;  %v1108_v1 = vld [vmem:[%s1395_s5] sm:$0xff]   ;;  %v1109_v2 = vld [vmem:[%s1395_s5 + $0x8] sm:$0xff]  }
  0x17   :  { %930 = vmatpush3.bf16.msra.mxu0 %v1062_v21  ;;  %v846_v4 = vld [vmem:[%s1396_s2] ss:$0 sm:$0xff] }
  0x18   :  { %931 = vmatprep.subr.bf16.mxu0 %v1065_v24 }
  0x19   :  { %952 = vmatpush3.bf16.msra.mxu1 %v1064_v23 }
  0x1a   :  { %953 = vmatprep.subr.bf16.mxu1 %v1067_v26 }
  0x1b   :  { %932 = vmatpush3.bf16.msra.mxu0 %v1066_v25 }
  0x1c   :  { %933 = vmatprep.subr.bf16.mxu0 %v1069_v28 }
  0x1d   :  { %954 = vmatpush3.bf16.msra.mxu1 %v1068_v27 }
  0x1e   :  { %955 = vmatprep.subr.bf16.mxu1 %v1071_v30 }
  0x1f   :  { %934 = vmatpush3.bf16.msra.mxu0 %v1070_v29 }
  0x20   :  { %963 = vmatprep.subr.bf16.mxu0 %v1076_v34 }
  0x21   :  { %956 = vmatpush3.bf16.msra.mxu1 %v1075_v33 }
  0x22   :  { %506 = vmatmul.mubr.bf16.vlgmr.msra.gmra.mrb[0].mxu0 %v1072_v31  ;;  %1001 = vmatprep.subr.bf16.mxu1 %v1112_v38 }
  0x23   :  { %964 = vmatpush3.bf16.msra.mxu0 %v1080_v37  ;;  %587 = vmatprep.mubr.bf16.mxu0 %v1098_v49  ;;  %v1110_v37 = vld [vmem:[%s1395_s5 + $0x10] sm:$0xff]  }
  0x24   :  { %547 = vmatmul.mubr.bf16.vlgmr.msra.gmra.mrb[0].mxu1 %v1077_v35  ;;  %965 = vmatprep.subr.bf16.mxu0 %v1081_v39  ;;  %v1111_v39 = vld [vmem:[%s1395_s5 + $0x18] sm:$0xff]  }
  0x25   :  { %1003 = vmatprep.mubr.msk.bf16.mxu1 %vm1113_vm0, %v1112_v38  ;;  %1002 = vmatpush3.bf16.msra.mxu1 %v1095_v48 }
  0x26   :  { %1007 = vmatprep.subr.bf16.mxu1 %v1112_v38 }
  0x27   :  { %966 = vmatpush3.bf16.msra.mxu0 %v1082_v40  ;;  %v904_v40 = vld [vmem:[%s1397_s4] ss:$0 sm:$0xff] }
  0x28   :  { %967 = vmatprep.subr.bf16.mxu0 %v1083_v41 }
  0x2b   :  { %968 = vmatpush3.bf16.msra.mxu0 %v1084_v42 }
  0x2c   :  { %969 = vmatprep.subr.bf16.mxu0 %v1085_v43  ;;  %1004 = vmatmul.mubr.msk.bf16.vlgmr.msra.gmra.mrb[4].mxu1 %vm469_vm1, %v1099_v50 }
  0x2d   :  { %1023 = vmatprep.mubr.msk.bf16.mxu1 %vm1113_vm0, %v1112_v38  ;;  %1008 = vmatpush3.bf16.msra.mxu1 %v1100_v57 }
  0x2e   :  { %1009 = vmatprep.subr.bf16.mxu1 %v1112_v38 }
  0x2f   :  { %970 = vmatpush3.bf16.msra.mxu0 %v1086_v44 }
  0x30   :  { %971 = vmatprep.subr.bf16.mxu0 %v1087_v45 }
  0x31   :  { %1010 = vmatpush3.bf16.msra.mxu1 %v1101_v58 }
  0x32   :  { %1011 = vmatprep.subr.bf16.mxu1 %v1112_v38 }
  0x33   :  { %972 = vmatpush3.bf16.msra.mxu0 %v1088_v46 }
  0x34   :  { %973 = vmatprep.subr.bf16.mxu0 %v1089_v47 }
  0x35   :  { %1012 = vmatpush3.bf16.msra.mxu1 %v1102_v59 }
  0x36   :  { %1013 = vmatprep.subr.bf16.mxu1 %v1112_v38 }
  0x37   :  { %974 = vmatpush3.bf16.msra.mxu0 %v1090_v51 }
  0x38   :  { %975 = vmatprep.subr.bf16.mxu0 %v1091_v52 }
  0x39   :  { %1014 = vmatpush3.bf16.msra.mxu1 %v1103_v60 }
  0x3a   :  { %1015 = vmatprep.subr.bf16.mxu1 %v1112_v38 }
  0x3b   :  { %976 = vmatpush3.bf16.msra.mxu0 %v1092_v53 }
  0x3c   :  { %977 = vmatprep.subr.bf16.mxu0 %v1093_v54 }
  0x3d   :  { %1016 = vmatpush3.bf16.msra.mxu1 %v1104_v61 }
  0x3e   :  { %1017 = vmatprep.subr.bf16.mxu1 %v1112_v38 }
  0x3f   :  { %978 = vmatpush3.bf16.msra.mxu0 %v1094_v55 }
  0x40   :  { %1027 = vmatprep.subr.bf16.mxu0 %v1112_v38 }
  0x41   :  { %1018 = vmatpush3.bf16.msra.mxu1 %v1105_v62 }
  0x42   :  { %588 = vmatmul.mubr.bf16.vlgmr.msra.gmra.mrb[4].mxu0 %v1096_v56  ;;  %1019 = vmatprep.subr.bf16.mxu1 %v1112_v38 }
  0x43   :  { %1035 = vmatprep.mubr.msk.bf16.mxu0 %vm1113_vm0, %v1112_v38  ;;  %1028 = vmatpush3.bf16.msra.mxu0 %v1108_v1 }
  0x44   :  { %1029 = vmatprep.subr.bf16.mxu0 %v1112_v38 }
  0x45   :  { %1020 = vmatpush3.bf16.msra.mxu1 %v1106_v63 }
  0x46   :  { %1021 = vmatprep.subr.bf16.mxu1 %v1112_v38 }
  0x47   :  { %1030 = vmatpush3.bf16.msra.mxu0 %v1109_v2 }
  0x48   :  { %1031 = vmatprep.subr.bf16.mxu0 %v1112_v38 }
  0x49   :  { %1022 = vmatpush3.bf16.msra.mxu1 %v1107_v0 }
  0x4b   :  { %1032 = vmatpush3.bf16.msra.mxu0 %v1110_v37 }
  0x4c   :  { %1033 = vmatprep.subr.bf16.mxu0 %v1112_v38  ;;  %v913_v38 = vld [vmem:[%s1398_s6] ss:$0 sm:$0xff] }
  0x4f   :  { %1034 = vmatpush3.bf16.msra.mxu0 %v1111_v39 }
  0xf5   :  { %v935_v3 = vpop.f32.mrb[0].mxu0 }
  0xf6   :  { %v936_v5 = vpop.f32.mrb[1].mxu0 }
  0xf7   :  { %v937_v6 = vadd.f32 %v936_v5, %v935_v3  ;;  %v938_v7 = vpop.f32.mrb[2].mxu0  ;;  %v957_v8 = vpop.f32.mrb[0].mxu1 }
  0xf8   :  { %v939_v9 = vpop.f32.mrb[3].mxu0  ;;  %v958_v12 = vpop.f32.mrb[1].mxu1 }
  0xf9   :  { %v508_v10 = vadd.f32 %v937_v6, %v846_v4  ;;  %v940_v11 = vadd.f32 %v939_v9, %v938_v7  ;;  %v959_v13 = vadd.f32 %v958_v12, %v957_v8  ;;  %v960_v14 = vpop.f32.mrb[2].mxu1 }
  0xfa   :  { %v961_v16 = vpop.f32.mrb[3].mxu1 }
  0xfb   :  { %v511_v15 = vadd.f32 %v940_v11, %v846_v4  ;;  %v549_v17 = vadd.f32 %v959_v13, %v508_v10  ;;  %v962_v18 = vadd.f32 %v961_v16, %v960_v14 }
  0xfd   :  { %v552_v19 = vadd.f32 %v962_v18, %v511_v15 }
  0xff   :  { %v630_v20 = vpop.f32.mrb[4].mxu1 }
 0x100   :  { %v1005_v21 = vpop.f32.mrb[5].mxu1 }
 0x101   :  { %v633_v22 = vpop.f32.mrb[6].mxu1 }
 0x102   :  { %v1006_v23 = vpop.f32.mrb[7].mxu1 }
 0x115   :  { %v979_v24 = vpop.f32.mrb[4].mxu0 }
 0x116   :  { %v980_v25 = vpop.f32.mrb[5].mxu0 }
 0x117   :  { %v981_v26 = vadd.f32 %v980_v25, %v979_v24  ;;  %v982_v27 = vpop.f32.mrb[6].mxu0 }
 0x118   :  { %v983_v28 = vpop.f32.mrb[7].mxu0 }
 0x119   :  { %v590_v29 = vadd.f32 %v981_v26, %v549_v17  ;;  %v984_v30 = vadd.f32 %v983_v28, %v982_v27 }
 0x11b   :  { %v631_v31 = vadd.f32 %v630_v20, %v590_v29  ;;  %v593_v32 = vadd.f32 %v984_v30, %v552_v19 }
 0x11d   :  { %v634_v33 = vadd.f32 %v633_v22, %v593_v32  ;;  %v637_v34 = vmax.f32 %v631_v31, 0.0 }
 0x11f   :  { %v638_v35 = vmax.f32 %v634_v33, 0.0 }
 0x121   :  { %v639_v36 = vpack.c.bf16 %v638_v35, %v637_v34 }
 0x123   :  { %1024 = vmatmul.mubr.bf16.vlgmr.msra.gmra.mrb[8].mxu1 %v639_v36 }
 0x1f6   :  { %v745_v41 = vpop.f32.mrb[8].mxu1 }
 0x1f7   :  { %v746_v42 = vadd.f32 %v904_v40, %v745_v41  ;;  %v1025_v43 = vpop.f32.mrb[9].mxu1 }
 0x1f8   :  { %v748_v44 = vpop.f32.mrb[10].mxu1 }
 0x1f9   :  { %v749_v45 = vadd.f32 %v904_v40, %v748_v44  ;;  %v1026_v46 = vpop.f32.mrb[11].mxu1  ;;  %v752_v47 = vmax.f32 %v746_v42, 0.0 }
 0x1fb   :  { %v753_v48 = vmax.f32 %v749_v45, 0.0 }
 0x1fd   :  { %v754_v49 = vpack.c.bf16 %v753_v48, %v752_v47 }
 0x1ff   :  { %1036 = vmatmul.mubr.msk.bf16.vlgmr.msra.gmra.mrb[8].mxu0 %vm794_vm2, %v754_v49 }
 0x2d2   :  { %v832_v50 = vpop.f32.mrb[8].mxu0 }
 0x2d3   :  { %v833_v51 = vadd.f32 %v913_v38, %v832_v50  ;;  %v1037_v52 = vpop.f32.mrb[9].mxu0 }
 0x2d4   :  { %v835_v53 = vpop.f32.mrb[10].mxu0 }
 0x2d5   :  { %840 = vst.msk [vmem:[%s1399_s7] sm:$0xff] %vm839_vm3, %v833_v51  ;;  %v836_v54 = vadd.f32 %v913_v38, %v835_v53  ;;  %v1038_v55 = vpop.f32.mrb[11].mxu0 }
 0x2d7   :  { %841 = vst.msk [vmem:[%s1399_s7 + $0x8] sm:$0xff] %vm839_vm3, %v836_v54 }

</bundles_post_ra>
